<compile_context>
chip_gen: v7x
topology: tpu7x:2x2x1
jax: 0.10.0
libtpu: 0.0.40
codegen_flags: <defaults>
</compile_context>

<pallas_src>
import jax
import jax.numpy as jnp
from jax.experimental import pallas as pl
from jax.experimental.pallas import tpu as pltpu

_LANE = 128                 # TPU vreg lane width
_ROW_TILE = 4096            # rows per grid step for large batches (f32: 2 MiB/tile)
_SINGLE_STEP_MAX_ROWS = 2048  # up to ~1 MiB input -> one grid step (launch-bound regime)


def _round_up(x, m):
    return ((x + m - 1) // m) * m


def _logreg_kernel(w_ref, b_ref, x_ref, o_ref):
    # w_ref, b_ref: (1, 1) scalars in SMEM.  x_ref / o_ref: (block_rows, 128) VMEM tiles.
    w = w_ref[0, 0]
    b = b_ref[0, 0]
    x = x_ref[...].astype(jnp.float32)
    # Degenerate Linear(1, 1): scalar broadcast FMA on the VPU (no MXU, no transpose).
    z = x * w + b
    # sigmoid(z) = 0.5 * (1 + tanh(0.5 * z)) -> single EUP op per element, exact.
    y = 0.5 * (jnp.tanh(0.5 * z) + 1.0)
    o_ref[...] = y.astype(o_ref.dtype)


def logistic_regression_forward(x, weight, bias):
    """x: (B, 1), weight: (1, 1), bias: (1,)  ->  sigmoid(x @ W^T + b), shape (B, 1)."""
    B, in_f = x.shape
    out_f, _ = weight.shape
    assert in_f == 1 and out_f == 1, "LogisticRegressionModel uses Linear(1, 1)"

    # Lane-dense layout: map the batch onto (rows, 128) so stores are full-width vst's.
    xf = x.reshape(-1)
    n = xf.shape[0]
    rows = pl.cdiv(n, _LANE)
    rows_pad = max(8, _round_up(rows, 8))       # minimal (8, 128)-aligned padding only
    n_pad = rows_pad * _LANE

    needs_pad = n_pad != n
    if needs_pad:
        xp = jnp.pad(xf, (0, n_pad - n)).reshape(rows_pad, _LANE)
    else:
        xp = xf.reshape(rows_pad, _LANE)        # free reshape, no extra HBM traffic

    # Tile selection: single step for small batches; otherwise big tiles with >= 2
    # grid steps so both v7x TensorCores share the "parallel" axis.
    if rows_pad <= _SINGLE_STEP_MAX_ROWS:
        block_rows = rows_pad
    else:
        half = _round_up(pl.cdiv(rows_pad, 2), 8)
        block_rows = min(_ROW_TILE, half)
    grid = (pl.cdiv(rows_pad, block_rows),)

    w2 = weight.reshape(1, 1)
    b2 = bias.reshape(1, 1)

    # Donate the padded input buffer as the output when we made a fresh copy anyway.
    io_aliases = {2: 0} if needs_pad else {}

    out = pl.pallas_call(
        _logreg_kernel,
        out_shape=jax.ShapeDtypeStruct((rows_pad, _LANE), x.dtype),
        grid=grid,
        in_specs=[
            pl.BlockSpec(memory_space=pltpu.MemorySpace.SMEM),   # weight scalar
            pl.BlockSpec(memory_space=pltpu.MemorySpace.SMEM),   # bias scalar
            pl.BlockSpec((block_rows, _LANE), lambda i: (i, 0)),
        ],
        out_specs=pl.BlockSpec((block_rows, _LANE), lambda i: (i, 0)),
        input_output_aliases=io_aliases,
        compiler_params=pltpu.CompilerParams(
            dimension_semantics=("parallel",),
            vmem_limit_bytes=32 * 1024 * 1024,
        ),
    )(w2, b2, xp)

    if needs_pad:
        return out.reshape(-1)[:n].reshape(B, out_f)
    return out.reshape(B, out_f)


if __name__ == "__main__":
    key = jax.random.PRNGKey(0)
    kx, kw, kb = jax.random.split(key, 3)

    # Small batch of scalar features, consistent with Linear(1, 1).
    batch = 8
    x = jax.random.normal(kx, (batch, 1), dtype=jnp.float32)

    # Deterministic parameter init (PyTorch default: U(-1, 1) since fan_in = 1).
    weight = jax.random.uniform(kw, (1, 1), minval=-1.0, maxval=1.0, dtype=jnp.float32)
    bias = jax.random.uniform(kb, (1,), minval=-1.0, maxval=1.0, dtype=jnp.float32)

    out = logistic_regression_forward(x, weight, bias)
    jax.block_until_ready(out)

    # Pure-JAX reference check (exact tanh-form sigmoid -> tight tolerance).
    ref = jax.nn.sigmoid(x @ weight.T + bias)
    assert out.shape == ref.shape
    assert jnp.allclose(out, ref, atol=1e-5, rtol=1e-5), "mismatch vs reference"
    print("KERNEL_OK")
</pallas_src>

<mosaic_0001>
module attributes {stable_mosaic.version = 11 : i64} {
  func.func @_logreg_kernel(%arg0: i32, %arg1: memref<1x1xf32, #tpu.memory_space<smem>>, %arg2: memref<1x1xf32, #tpu.memory_space<smem>>, %arg3: memref<8x128xf32, #tpu.memory_space<vmem>>, %arg4: memref<8x128xf32, #tpu.memory_space<vmem>>) attributes {dimension_semantics = [#tpu.dimension_semantics<parallel>], iteration_bounds = array<i64: 1>, scalar_prefetch = 0 : i64, scratch_operands = 0 : i64, tpu.core_type = #tpu.core_type<tc>, window_params = [{transform_indices = @transform_0, window_bounds = array<i64: 1, 1>}, {transform_indices = @transform_1, window_bounds = array<i64: 1, 1>}, {transform_indices = @transform_2, window_bounds = array<i64: 8, 128>}, {transform_indices = @transform_3, window_bounds = array<i64: 8, 128>}]} {
    %c0 = arith.constant 0 : index
    %c0_0 = arith.constant 0 : index
    %0 = memref.load %arg1[%c0, %c0_0] : memref<1x1xf32, #tpu.memory_space<smem>>
    %c0_1 = arith.constant 0 : index
    %c0_2 = arith.constant 0 : index
    %1 = memref.load %arg2[%c0_1, %c0_2] : memref<1x1xf32, #tpu.memory_space<smem>>
    %c0_3 = arith.constant 0 : index
    %c0_4 = arith.constant 0 : index
    %2 = vector.load %arg3[%c0_3, %c0_4] : memref<8x128xf32, #tpu.memory_space<vmem>>, vector<8x128xf32>
    %3 = vector.broadcast %0 : f32 to vector<8x128xf32>
    %4 = arith.mulf %2, %3 : vector<8x128xf32>
    %5 = vector.broadcast %1 : f32 to vector<8x128xf32>
    %6 = arith.addf %4, %5 : vector<8x128xf32>
    %cst = arith.constant 5.000000e-01 : f32
    %7 = vector.broadcast %cst : f32 to vector<8x128xf32>
    %8 = arith.mulf %7, %6 : vector<8x128xf32>
    %9 = math.tanh %8 : vector<8x128xf32>
    %cst_5 = arith.constant 1.000000e+00 : f32
    %10 = vector.broadcast %cst_5 : f32 to vector<8x128xf32>
    %11 = arith.addf %9, %10 : vector<8x128xf32>
    %cst_6 = arith.constant 5.000000e-01 : f32
    %12 = vector.broadcast %cst_6 : f32 to vector<8x128xf32>
    %13 = arith.mulf %12, %11 : vector<8x128xf32>
    %c0_7 = arith.constant 0 : index
    %c0_8 = arith.constant 0 : index
    %14 = vector.load %arg4[%c0_7, %c0_8] : memref<8x128xf32, #tpu.memory_space<vmem>>, vector<8x128xf32>
    tpu.vector_store %arg4[%c0_7, %c0_8], %13 {strides = array<i32>} : memref<8x128xf32, #tpu.memory_space<vmem>>, vector<8x128xf32>,
    return
  }
  func.func @transform_0(%arg0: i32) -> (i32, i32) {
    %c0_i32 = arith.constant 0 : i32
    %c0_i32_0 = arith.constant 0 : i32
    %c0_i32_1 = arith.constant 0 : i32
    return %c0_i32, %c0_i32_0 : i32, i32
  }
  func.func @transform_1(%arg0: i32) -> (i32, i32) {
    %c0_i32 = arith.constant 0 : i32
    %c0_i32_0 = arith.constant 0 : i32
    %c0_i32_1 = arith.constant 0 : i32
    return %c0_i32, %c0_i32_0 : i32, i32
  }
  func.func @transform_2(%arg0: i32) -> (i32, i32) {
    %c0_i32 = arith.constant 0 : i32
    %c0_i32_0 = arith.constant 0 : i32
    return %arg0, %c0_i32 : i32, i32
  }
  func.func @transform_3(%arg0: i32) -> (i32, i32) {
    %c0_i32 = arith.constant 0 : i32
    %c0_i32_0 = arith.constant 0 : i32
    return %arg0, %c0_i32 : i32, i32
  }
}

</mosaic_0001>

<bundles_post_ra>
// kernel: tpu_custom_call.1
= control target key start
LH: loop header
LB: loop body
LE: loop exit
PB: predicated region body
PF: predicated region fallthrough
CT: control target
= control target key end

     0   :  { %10 = vsyncpa [#allocation5], 0  ;;  %s160_s0 = inlined_call_operand.<no memory space> [shape: f32[1,1], index: 0, kind: input, shape index: {}]   ;;  %s161_s1 = inlined_call_operand.<no memory space> [shape: f32[1,1], index: 1, kind: input, shape index: {}]   ;;  %s162_s2 = inlined_call_operand.hbm [shape: f32[8,128], index: 2, kind: input, shape index: {}, may-alias: {2,3}]   ;;  %s163_s3 = inlined_call_operand.hbm [shape: f32[8,128], index: 3, kind: output, shape index: {}, may-alias: {2,3}]  }
   0x1   :  { %11 = vsyncpa [#allocation6], 0  ;;  %s108_s12 = smov [#allocation4]   ;;  %s60_s16 = scalar_lea.hbm %s162_s2, 128 }
   0x2   :  { %s22_s13 = sshll.u32 %s108_s12, 4  ;;  %p61_p0 = scmp.ne.s32.totalorder %s162_s2, %s60_s16  ;;  %s23_s13 = int_to_ptr.vmem [resolvable:$true] %s22_s13 }
   0x3   :  { %p64_p1 = scmp.lt.u32.totalorder %s60_s16, %s162_s2 }
   0x5   :  { %p66_p2 = pnand %p64_p1, %p61_p0 }
   0x7   :  { %69 = shalt.err (!%p66_p2)
}
   0x8   :  { %s70_s21 = scalar_lea.vmem %s23_s13, 128  ;;  %p75_p4 = scmp.lt.s32.totalorder %s23_s13, %s23_s13 }
   0x9   :  { %p71_p3 = scmp.ne.s32.totalorder %s23_s13, %s70_s21  ;;  %p76_p5 = scmp.lt.s32.totalorder %s70_s21, %s70_s21 }
   0xb   :  { %p77_p6 = por %p76_p5, %p75_p4 }
   0xd   :  { %p78_p7 = pnand %p77_p6, %p71_p3 }
   0xf   :  { %81 = shalt.err (!%p78_p7)
}
  0x10   :  { %25 = dma.hbm_to_vmem [thread:$0]  %s162_s2, 128, %s23_s13, [#allocation5]  }
  0x11   :  { %104 = dma.done.wait [#allocation5], 128  }
  0x12   :  { %105 = vsyncadd [#allocation5], 4294967168  ;;  %v32_v0 = vstv %s160_s0  ;;  %v31_v1 = vld [vmem:[#allocation4] sm:$0xff]  ;;  %v34_v2 = vstv %s161_s1  ;;  %s109_s28 = smov [#allocation7]  }
  0x13   :  { %v33_v3 = vmul.f32 %v32_v0, %v31_v1  ;;  %s47_s29 = sshll.u32 %s109_s28, 4  ;;  %s48_s29 = int_to_ptr.vmem [resolvable:$true] %s47_s29 }
  0x14   :  { %s82_s2 = scalar_lea.vmem %s48_s29, 128  ;;  %p87_p9 = scmp.lt.s32.totalorder %s48_s29, %s48_s29 }
  0x15   :  { %v35_v4 = vadd.f32 %v34_v2, %v33_v3  ;;  %p83_p8 = scmp.ne.s32.totalorder %s48_s29, %s82_s2  ;;  %p88_p10 = scmp.lt.s32.totalorder %s82_s2, %s82_s2 }
  0x17   :  { %v36_v5 = vmul.f32 0.5, %v35_v4  ;;  %p89_p11 = por %p88_p10, %p87_p9 }
  0x19   :  { %58 = vtanh.f32 %v36_v5  ;;  %p90_p12 = pnand %p89_p11, %p83_p8 }
  0x23   :  { %v59_v6 = vpop.eup %58 }
  0x24   :  { %v38_v7 = vadd.f32 1.0, %v59_v6 }
  0x26   :  { %v39_v8 = vmul.f32 0.5, %v38_v7 }
  0x28   :  { %40 = vst [vmem:[#allocation7] sm:$0xff] %v39_v8 }
  0x29   :  { %93 = shalt.err (!%p90_p12)
}
  0x2a   :  { %s94_s30 = scalar_lea.hbm %s163_s3, 128 }
  0x2b   :  { %p95_p13 = scmp.ne.s32.totalorder %s163_s3, %s94_s30  ;;  %p98_p0 = scmp.lt.u32.totalorder %s94_s30, %s163_s3 }
  0x2d   :  { %p100_p1 = pnand %p98_p0, %p95_p13 }
  0x2f   :  { %103 = shalt.err (!%p100_p1)
}
  0x30   :  { %50 = dma.vmem_to_hbm [thread:$0]  %s48_s29, 128, %s163_s3, [#allocation6]  }
  0x31   :  { %106 = dma.done.wait [#allocation6], 128  }
  0x32   :  { %107 = vsyncadd [#allocation6], 4294967168 }
  0x33   :  { %54 = vsyncpa [#allocation5], 1 }
  0x34   :  { %55 = vsyncpa [#allocation6], 1 }

</bundles_post_ra>
